<compile_context>
chip_gen: v7x
topology: tpu7x:2x2x1
jax: 0.10.0
libtpu: 0.0.40
codegen_flags: <defaults>
</compile_context>

<pallas_src>
import functools

import numpy as np
import jax
import jax.numpy as jnp
from jax import lax
from jax.experimental import pallas as pl
from jax.experimental.pallas import tpu as pltpu


def _round_up(x, m):
    return ((x + m - 1) // m) * m


def _vmem_capacity_bytes():
    try:
        return int(pltpu.get_tpu_info().vmem_capacity_bytes)
    except Exception:
        return 64 << 20  # conservative fallback (v7x per-core VMEM)


_VMEM_CAPACITY = _vmem_capacity_bytes()


def make_stft_basis(window, n_fft):
    """Host-side (NumPy) precompute of the fused real-DFT basis.

    Returns a (N_pad, K_pad) bf16 array (bins-major, K on lanes):
      rows [0            : n_bins)  =  w * cos(2*pi*n*k/n_fft)   (real part)
      rows [n_half_pad   : +n_bins) = -w * sin(2*pi*n*k/n_fft)   (imag part)
    with n_half_pad = round_up(n_bins, 128), K_pad = round_up(n_fft, 128).
    The window is zero-padded to n_fft, centered (torch.stft semantics).
    Build this ONCE (window is a fixed, non-trainable Hann buffer).
    """
    window = np.asarray(window, dtype=np.float64)
    wl = window.shape[0]
    lpad = (n_fft - wl) // 2
    win = np.zeros(n_fft, dtype=np.float64)
    win[lpad:lpad + wl] = window

    n_bins = n_fft // 2 + 1
    nn = np.arange(n_fft, dtype=np.float64)[:, None]
    kk = np.arange(n_bins, dtype=np.float64)[None, :]
    ang = 2.0 * np.pi * nn * kk / n_fft
    cos_b = (win[:, None] * np.cos(ang)).T          # (n_bins, n_fft)
    sin_b = -(win[:, None] * np.sin(ang)).T         # (n_bins, n_fft), sign folded

    n_half_pad = _round_up(n_bins, 128)
    k_pad = _round_up(n_fft, 128)
    basis = np.zeros((2 * n_half_pad, k_pad), dtype=np.float32)
    basis[:n_bins, :n_fft] = cos_b
    basis[n_half_pad:n_half_pad + n_bins, :n_fft] = sin_b
    return jnp.asarray(basis, dtype=jnp.bfloat16)


def _stft_kernel(basis_ref, frames_ref, out_ref):
    # basis_ref : (TN, K_pad) bf16   -- bins-major fused basis tile (resident)
    # frames_ref: (TF, K_pad) bf16   -- streamed frame tile
    # out_ref   : (TN, TF)    f32    -- bins-major, lane-dense output tile
    # Single MXU matmul with rhs-transposed contraction (flash-attention pattern),
    # f32 accumulation.
    out_ref[...] = lax.dot_general(
        basis_ref[...], frames_ref[...],
        dimension_numbers=(((1,), (1,)), ((), ())),
        preferred_element_type=jnp.float32,
    )


def _select_tiles(n_pad, k_pad, tf):
    """Pick the largest bins-tile TN (multiple of 128, dividing n_pad) whose
    double-buffered VMEM footprint fits ~80% of the detected VMEM capacity,
    and a matching vmem_limit_bytes with headroom."""
    budget = int(_VMEM_CAPACITY * 0.8)
    cands = [d * 128 for d in range(n_pad // 128, 0, -1) if n_pad % (d * 128) == 0]

    def footprint(tn):
        # basis (2 bufs) + frames (2 bufs) + out (2 bufs), bf16/bf16/f32
        return 2 * tn * k_pad * 2 + 2 * tf * k_pad * 2 + 2 * tn * tf * 4

    tn = cands[-1]
    need = footprint(tn)
    for c in cands:
        if footprint(c) <= budget:
            tn, need = c, footprint(c)
            break
    vmem_limit = max(need + (4 << 20), 16 << 20)
    return tn, int(vmem_limit)


@functools.partial(jax.jit, static_argnames=("n_fft", "n_hop", "center"))
def stft_pallas(x, basis, *, n_fft, n_hop, center=True):
    """x: (B, C, T) float32, basis: precomputed bf16 basis from make_stft_basis.

    Returns (B, C, n_fft//2 + 1, n_frames, 2) float32 (real, imag), matching
    the PyTorch _STFT module.
    """
    B, C, T = x.shape
    BC = B * C
    n_bins = n_fft // 2 + 1
    n_half_pad = basis.shape[0] // 2
    n_pad = 2 * n_half_pad
    k_pad = basis.shape[1]

    # bf16 early: halves HBM traffic of the framing gather; kernel inputs are bf16 anyway.
    xf = x.reshape(BC, T).astype(jnp.bfloat16)
    if center:
        pad = n_fft // 2
        xf = jnp.pad(xf, ((0, 0), (pad, pad)), mode="reflect")
    padded_len = xf.shape[1]
    n_frames = 1 + (padded_len - n_fft) // n_hop

    # --- glue: frame extraction (see TODO(synk) above about in-kernel framing) ---
    starts = jnp.arange(n_frames) * n_hop
    idx = starts[:, None] + jnp.arange(n_fft)[None, :]            # (n_frames, n_fft)
    frames = xf[:, idx]                                           # (BC, n_frames, n_fft) bf16

    # --- tiling ---
    TF = 256                                   # frames (lanes) per output tile
    TN, vmem_limit = _select_tiles(n_pad, k_pad, TF)
    f_pad = _round_up(n_frames, TF)
    frames = jnp.pad(frames, ((0, 0), (0, f_pad - n_frames), (0, k_pad - n_fft)))

    out = pl.pallas_call(
        _stft_kernel,
        out_shape=jax.ShapeDtypeStruct((BC, n_pad, f_pad), jnp.float32),
        grid_spec=pltpu.PrefetchScalarGridSpec(
            num_scalar_prefetch=0,
            # n outermost (serial per core), bc / frame tiles stream innermost.
            grid=(n_pad // TN, BC, f_pad // TF),
            in_specs=[
                # Basis tile: block index depends only on the outermost axis, so it
                # is DMA'd once per n-tile and stays VMEM-resident across (bc, f).
                pl.BlockSpec((TN, k_pad), lambda n, bc, f: (n, 0)),
                # Streamed frame tile (leading bc dim squeezed out of the kernel ref).
                pl.BlockSpec((None, TF, k_pad), lambda n, bc, f: (bc, f, 0)),
            ],
            out_specs=pl.BlockSpec((None, TN, TF), lambda n, bc, f: (bc, n, f)),
        ),
        compiler_params=pltpu.CompilerParams(
            # n "arbitrary" pins the serial outer sweep (preserves basis reuse);
            # bc / frame-tile axes shard across TensorCores on megacore parts.
            dimension_semantics=("arbitrary", "parallel", "parallel"),
            vmem_limit_bytes=vmem_limit,
        ),
    )(basis, frames)

    # --- glue: bins-major kernel output -> module layout with slices + stack only ---
    real = out[:, :n_bins, :n_frames]                             # (BC, n_bins, n_frames)
    imag = out[:, n_half_pad:n_half_pad + n_bins, :n_frames]      # (BC, n_bins, n_frames)
    res = jnp.stack([real, imag], axis=-1)                        # (BC, n_bins, n_frames, 2)
    return res.reshape(B, C, n_bins, n_frames, 2)


def hann_window_np(window_length):
    # torch.hann_window default (periodic=True): 0.5 * (1 - cos(2*pi*n / N))
    n = np.arange(window_length, dtype=np.float64)
    return 0.5 * (1.0 - np.cos(2.0 * np.pi * n / window_length))


if __name__ == "__main__":
    # Small shapes consistent with the module's forward:
    # (nb_samples=2, nb_channels=2, nb_timesteps=128), n_fft=32, n_hop=8
    B, C, T = 2, 2, 128
    n_fft, n_hop, window_length = 32, 8, 32

    key = jax.random.PRNGKey(0)
    x = jax.random.normal(key, (B, C, T), dtype=jnp.float32)

    window_np = hann_window_np(window_length)        # fixed, non-trainable parameter
    basis = make_stft_basis(window_np, n_fft)        # built once, outside jit

    out = stft_pallas(x, basis, n_fft=n_fft, n_hop=n_hop, center=True)
    out = jax.block_until_ready(out)

    # sanity: shape matches (B, C, n_fft//2+1, n_frames, 2)
    n_frames = 1 + (T + 2 * (n_fft // 2) - n_fft) // n_hop
    n_bins = n_fft // 2 + 1
    assert out.shape == (B, C, n_bins, n_frames, 2), out.shape

    # numeric sanity check against jnp.fft.rfft reference (f32)
    win = jnp.asarray(window_np, dtype=jnp.float32)
    xp = jnp.pad(x.reshape(B * C, T), ((0, 0), (n_fft // 2, n_fft // 2)), mode="reflect")
    idx = (jnp.arange(n_frames) * n_hop)[:, None] + jnp.arange(n_fft)[None, :]
    ref_frames = xp[:, idx] * win[None, None, :]
    ref = jnp.fft.rfft(ref_frames, axis=-1)                     # (B*C, n_frames, n_bins)
    ref = jnp.stack([ref.real, ref.imag], axis=-1)
    ref = ref.reshape(B, C, n_frames, n_bins, 2).transpose(0, 1, 3, 2, 4)

    # bf16 matmul inputs with f32 accumulation -> tolerance scaled to output magnitude.
    scale = float(jnp.max(jnp.abs(ref)))
    err = float(jnp.max(jnp.abs(out - ref)))
    assert err <= 2e-2 * scale + 1e-3, (err, scale)

    print("KERNEL_OK")
</pallas_src>

<mosaic_0001>
module attributes {stable_mosaic.version = 11 : i64} {
  func.func @_stft_kernel(%arg0: i32, %arg1: i32, %arg2: i32, %arg3: memref<256x128xbf16, #tpu.memory_space<vmem>>, %arg4: memref<1x256x128xbf16, #tpu.memory_space<vmem>>, %arg5: memref<1x256x256xf32, #tpu.memory_space<vmem>>) attributes {dimension_semantics = [#tpu.dimension_semantics<arbitrary>, #tpu.dimension_semantics<parallel>, #tpu.dimension_semantics<parallel>], iteration_bounds = array<i64: 1, 4, 1>, scalar_prefetch = 0 : i64, scratch_operands = 0 : i64, tpu.core_type = #tpu.core_type<tc>, window_params = [{transform_indices = @transform_0, window_bounds = array<i64: 256, 128>}, {transform_indices = @transform_1, window_bounds = array<i64: 1, 256, 128>}, {transform_indices = @transform_2, window_bounds = array<i64: 1, 256, 256>}]} {
    %c0 = arith.constant 0 : index
    %c0_0 = arith.constant 0 : index
    %0 = vector.load %arg3[%c0, %c0_0] : memref<256x128xbf16, #tpu.memory_space<vmem>>, vector<256x128xbf16>
    %c0_1 = arith.constant 0 : index
    %c0_2 = arith.constant 0 : index
    %c0_3 = arith.constant 0 : index
    %1 = vector.load %arg4[%c0_1, %c0_2, %c0_3] : memref<1x256x128xbf16, #tpu.memory_space<vmem>>, vector<1x256x128xbf16>
    %2 = vector.shape_cast %1 : vector<1x256x128xbf16> to vector<256x128xbf16>
    %cst = arith.constant dense<0.000000e+00> : vector<256x256xf32>
    %3 = tpu.matmul %0, %2, %cst {dimension_numbers = #tpu.dot_dimension_numbers<[1], [1], [0], [0], [0, 0, 1, 0], [], []>} : vector<256x128xbf16>, vector<256x128xbf16>, vector<256x256xf32> -> vector<256x256xf32>
    %c0_4 = arith.constant 0 : index
    %c0_5 = arith.constant 0 : index
    %c0_6 = arith.constant 0 : index
    %4 = vector.load %arg5[%c0_4, %c0_5, %c0_6] : memref<1x256x256xf32, #tpu.memory_space<vmem>>, vector<1x256x256xf32>
    %5 = vector.shape_cast %4 : vector<1x256x256xf32> to vector<256x256xf32>
    %6 = vector.shape_cast %3 : vector<256x256xf32> to vector<1x256x256xf32>
    tpu.vector_store %arg5[%c0_4, %c0_5, %c0_6], %6 {strides = array<i32>} : memref<1x256x256xf32, #tpu.memory_space<vmem>>, vector<1x256x256xf32>,
    return
  }
  func.func @transform_0(%arg0: i32, %arg1: i32, %arg2: i32) -> (i32, i32) {
    %c0_i32 = arith.constant 0 : i32
    %c0_i32_0 = arith.constant 0 : i32
    return %arg0, %c0_i32 : i32, i32
  }
  func.func @transform_1(%arg0: i32, %arg1: i32, %arg2: i32) -> (i32, i32, i32) {
    %c0_i32 = arith.constant 0 : i32
    %c0_i32_0 = arith.constant 0 : i32
    return %arg1, %arg2, %c0_i32 : i32, i32, i32
  }
  func.func @transform_2(%arg0: i32, %arg1: i32, %arg2: i32) -> (i32, i32, i32) {
    %c0_i32 = arith.constant 0 : i32
    return %arg1, %arg0, %arg2 : i32, i32, i32
  }
}

</mosaic_0001>

<bundles_post_ra>
// kernel: stft_pallas.1
= control target key start
LH: loop header
LB: loop body
LE: loop exit
PB: predicated region body
PF: predicated region fallthrough
CT: control target
= control target key end

     0   :  { %s1068_s9 = smov 0   ;;  %s1070_s10 = smov 0   ;;  %s1237_s0 = inlined_call_operand.vmem [shape: bf16[256,128], index: 0, kind: input, shape index: {}]   ;;  %s1238_s1 = inlined_call_operand.vmem [shape: bf16[4,256,128], index: 1, kind: input, shape index: {}]   ;;  %s1239_s2 = inlined_call_operand.vmem [shape: f32[4,256,256], index: 2, kind: output, shape index: {}]  }
   0x1   :  { %s1072_s11 = smov 0  }
   0x2 LB: > { %s27_s12 = sadd.s32 1, %s1047_s10  ;;  %p868_p0 = scmp.ge.s32.totalorder %s1051_s11, 1  ;;  %s1051_s11 = sphi %s1072_s11, %s12_s11   ;;  %s1047_s10 = sphi %s1070_s10, %s1241_s10   ;;  %s1043_s9 = sphi %s1068_s9, %s1240_s9  }
   0x3   : > { %p29_p1 = scmp.ge.s32.totalorder %s27_s12, 4  ;;  %p153_p2 = scmp.lt.s32.totalorder %s1051_s11, 5 }
   0x5   : > { %s1243_s12 = smov (%p29_p1, %s27_s12), 0  ;;  %p154_p3 = pnand %p868_p0, %p153_p2 }
   0x6   : > { %p200_p4 = scmp.lt.s32.totalorder (!%p154_p3), %s1043_s9, 3  ;;  %v1013_v0 = vld [vmem:[%s1237_s0] sm:$0xff] (!%p154_p3)   ;;  %v1015_v18 = vld [vmem:[%s1237_s0 + $0x8] sm:$0xff] (!%p154_p3)   ;;  %v1017_v20 = vld [vmem:[%s1237_s0 + $0x10] sm:$0xff] (!%p154_p3)  }
   0x7   : > { %157 = sbr.rel (%p154_p3) target bundleno = 354 (0x162), region = 28  ;;  %v1014_v1 = vld [vmem:[%s1237_s0 + $0x40] sm:$0xff] (!%p154_p3)   ;;  %925 = vmatprep.mubr.bf16.mxu0 (!%p154_p3), %v1013_v0  ;;  %v1016_v19 = vld [vmem:[%s1237_s0 + $0x48] sm:$0xff] (!%p154_p3)   ;;  %v1018_v21 = vld [vmem:[%s1237_s0 + $0x50] sm:$0xff] (!%p154_p3)  }
   0x8   : > { %941 = vmatprep.mubr.bf16.mxu1 (!%p154_p3), %v1014_v1  ;;  %v1019_v22 = vld [vmem:[%s1237_s0 + $0x18] sm:$0xff] (!%p154_p3)   ;;  %v1021_v24 = vld [vmem:[%s1237_s0 + $0x20] sm:$0xff] (!%p154_p3)   ;;  %v1023_v26 = vld [vmem:[%s1237_s0 + $0x28] sm:$0xff] (!%p154_p3)  }
   0x9   : > { %v1020_v23 = vld [vmem:[%s1237_s0 + $0x58] sm:$0xff] (!%p154_p3)   ;;  %v1022_v25 = vld [vmem:[%s1237_s0 + $0x60] sm:$0xff] (!%p154_p3)   ;;  %v1024_v27 = vld [vmem:[%s1237_s0 + $0x68] sm:$0xff] (!%p154_p3)  }
   0xa   : > { %v1025_v28 = vld [vmem:[%s1237_s0 + $0x30] sm:$0xff] (!%p154_p3)   ;;  %v1027_v30 = vld [vmem:[%s1237_s0 + $0x38] sm:$0xff] (!%p154_p3)  }
   0xb   : > { %v1026_v29 = vld [vmem:[%s1237_s0 + $0x70] sm:$0xff] (!%p154_p3)   ;;  %v1028_v31 = vld [vmem:[%s1237_s0 + $0x78] sm:$0xff] (!%p154_p3)  }
   0xe   : > { %s1245_s9 = smov (!%p200_p4, %s1043_s9), 3 }
   0xf   : > { %s907_s17 = sshll.u32 %s1245_s9, 7  ;;  %s908_s25 = sshll.u32 %s1245_s9, 9 }
  0x10   : > { %s1098_s20 = scalar_lea.vmem %s1238_s1, %s907_s17  ;;  %s1162_s28 = scalar_lea.vmem %s1239_s2, %s908_s25 }
  0x11   : > { %v997_v2 = vld [vmem:[%s1098_s20 + $0x40] sm:$0xff]   ;;  %v999_v4 = vld [vmem:[%s1098_s20 + $0x48] sm:$0xff]   ;;  %v1001_v6 = vld [vmem:[%s1098_s20 + $0x50] sm:$0xff]  }
  0x12   : > { %v998_v3 = vld [vmem:[%s1098_s20] sm:$0xff]   ;;  %909 = vmatprep.subr.bf16.mxu0 %v997_v2  ;;  %957 = vmatprep.subr.bf16.mxu1 %v997_v2  ;;  %v1000_v5 = vld [vmem:[%s1098_s20 + $0x8] sm:$0xff]   ;;  %v1002_v7 = vld [vmem:[%s1098_s20 + $0x10] sm:$0xff]  }
  0x13   : > { %910 = vmatpush3.bf16.xpose.msra.mxu0 %v998_v3  ;;  %965 = vmatpush3.bf16.xpose.msra.mxu1 %v998_v3  ;;  %v1003_v8 = vld [vmem:[%s1098_s20 + $0x58] sm:$0xff]   ;;  %v1005_v10 = vld [vmem:[%s1098_s20 + $0x60] sm:$0xff]   ;;  %v1007_v12 = vld [vmem:[%s1098_s20 + $0x68] sm:$0xff]  }
  0x14   : > { %911 = vmatprep.subr.bf16.mxu0 %v999_v4  ;;  %958 = vmatprep.subr.bf16.mxu1 %v999_v4  ;;  %v1004_v9 = vld [vmem:[%s1098_s20 + $0x18] sm:$0xff]   ;;  %v1006_v11 = vld [vmem:[%s1098_s20 + $0x20] sm:$0xff]   ;;  %v1008_v13 = vld [vmem:[%s1098_s20 + $0x28] sm:$0xff]  }
  0x15   : > { %v1009_v14 = vld [vmem:[%s1098_s20 + $0x70] sm:$0xff]   ;;  %v1011_v16 = vld [vmem:[%s1098_s20 + $0x78] sm:$0xff]  }
  0x16   : > { %v1010_v15 = vld [vmem:[%s1098_s20 + $0x30] sm:$0xff]   ;;  %v1012_v17 = vld [vmem:[%s1098_s20 + $0x38] sm:$0xff]  }
  0x1b   : > { %912 = vmatpush3.bf16.xpose.msra.mxu0 %v1000_v5  ;;  %966 = vmatpush3.bf16.xpose.msra.mxu1 %v1000_v5 }
  0x1c   : > { %913 = vmatprep.subr.bf16.mxu0 %v1001_v6  ;;  %959 = vmatprep.subr.bf16.mxu1 %v1001_v6 }
  0x23   : > { %914 = vmatpush3.bf16.xpose.msra.mxu0 %v1002_v7  ;;  %967 = vmatpush3.bf16.xpose.msra.mxu1 %v1002_v7 }
  0x24   : > { %915 = vmatprep.subr.bf16.mxu0 %v1003_v8  ;;  %960 = vmatprep.subr.bf16.mxu1 %v1003_v8 }
  0x2b   : > { %916 = vmatpush3.bf16.xpose.msra.mxu0 %v1004_v9  ;;  %968 = vmatpush3.bf16.xpose.msra.mxu1 %v1004_v9 }
  0x2c   : > { %917 = vmatprep.subr.bf16.mxu0 %v1005_v10  ;;  %961 = vmatprep.subr.bf16.mxu1 %v1005_v10 }
  0x33   : > { %918 = vmatpush3.bf16.xpose.msra.mxu0 %v1006_v11  ;;  %969 = vmatpush3.bf16.xpose.msra.mxu1 %v1006_v11 }
  0x34   : > { %919 = vmatprep.subr.bf16.mxu0 %v1007_v12  ;;  %962 = vmatprep.subr.bf16.mxu1 %v1007_v12 }
  0x3b   : > { %920 = vmatpush3.bf16.xpose.msra.mxu0 %v1008_v13  ;;  %970 = vmatpush3.bf16.xpose.msra.mxu1 %v1008_v13 }
  0x3c   : > { %921 = vmatprep.subr.bf16.mxu0 %v1009_v14  ;;  %963 = vmatprep.subr.bf16.mxu1 %v1009_v14 }
  0x43   : > { %922 = vmatpush3.bf16.xpose.msra.mxu0 %v1010_v15  ;;  %971 = vmatpush3.bf16.xpose.msra.mxu1 %v1010_v15 }
  0x44   : > { %923 = vmatprep.subr.bf16.mxu0 %v1011_v16  ;;  %964 = vmatprep.subr.bf16.mxu1 %v1011_v16 }
  0x4b   : > { %924 = vmatpush3.bf16.xpose.msra.mxu0 %v1012_v17  ;;  %972 = vmatpush3.bf16.xpose.msra.mxu1 %v1012_v17 }
  0x52   : > { %926 = vmatmul.mubr.bf16.vlgmr.msra.gmra.mrb[0].mxu0 %v1013_v0  ;;  %942 = vmatmul.mubr.bf16.vlgmr.msra.gmra.mrb[0].mxu1 %v1014_v1 }
  0x53   : > { %927 = vmatprep.mubr.bf16.mxu0 %v1015_v18  ;;  %943 = vmatprep.mubr.bf16.mxu1 %v1016_v19 }
  0x5a   : > { %928 = vmatmul.mubr.bf16.gmra.mrb[4].mxu0 %v1015_v18  ;;  %944 = vmatmul.mubr.bf16.gmra.mrb[4].mxu1 %v1016_v19 }
  0x5b   : > { %929 = vmatprep.mubr.bf16.mxu0 %v1017_v20  ;;  %945 = vmatprep.mubr.bf16.mxu1 %v1018_v21 }
  0x62   : > { %930 = vmatmul.mubr.bf16.gmra.mrb[8].mxu0 %v1017_v20  ;;  %946 = vmatmul.mubr.bf16.gmra.mrb[8].mxu1 %v1018_v21 }
  0x63   : > { %931 = vmatprep.mubr.bf16.mxu0 %v1019_v22  ;;  %947 = vmatprep.mubr.bf16.mxu1 %v1020_v23 }
  0x6a   : > { %932 = vmatmul.mubr.bf16.gmra.mrb[12].mxu0 %v1019_v22  ;;  %948 = vmatmul.mubr.bf16.gmra.mrb[12].mxu1 %v1020_v23 }
  0x6b   : > { %933 = vmatprep.mubr.bf16.mxu0 %v1021_v24  ;;  %949 = vmatprep.mubr.bf16.mxu1 %v1022_v25 }
  0x72   : > { %934 = vmatmul.mubr.bf16.gmra.mrb[16].mxu0 %v1021_v24  ;;  %950 = vmatmul.mubr.bf16.gmra.mrb[16].mxu1 %v1022_v25 }
  0x73   : > { %935 = vmatprep.mubr.bf16.mxu0 %v1023_v26  ;;  %951 = vmatprep.mubr.bf16.mxu1 %v1024_v27 }
  0x7a   : > { %936 = vmatmul.mubr.bf16.gmra.mrb[20].mxu0 %v1023_v26  ;;  %952 = vmatmul.mubr.bf16.gmra.mrb[20].mxu1 %v1024_v27 }
  0x7b   : > { %937 = vmatprep.mubr.bf16.mxu0 %v1025_v28  ;;  %953 = vmatprep.mubr.bf16.mxu1 %v1026_v29 }
  0x82   : > { %938 = vmatmul.mubr.bf16.gmra.mrb[24].mxu0 %v1025_v28  ;;  %954 = vmatmul.mubr.bf16.gmra.mrb[24].mxu1 %v1026_v29 }
  0x83   : > { %939 = vmatprep.mubr.bf16.mxu0 %v1027_v30  ;;  %955 = vmatprep.mubr.bf16.mxu1 %v1028_v31 }
  0x8a   : > { %940 = vmatmul.mubr.bf16.gmra.mrb[28].mxu0 %v1027_v30  ;;  %956 = vmatmul.mubr.bf16.gmra.mrb[28].mxu1 %v1028_v31 }
 0x125   : > { %v516_v32 = vpop.f32.mrb[0].mxu0  ;;  %v596_v33 = vpop.f32.mrb[0].mxu1 }
 0x126   : > { %675 = vst [vmem:[%s1162_s28] sm:$0xff] %v516_v32  ;;  %707 = vst [vmem:[%s1162_s28 + $0x100] sm:$0xff] %v596_v33  ;;  %v518_v34 = vpop.f32.mrb[1].mxu0  ;;  %v598_v35 = vpop.f32.mrb[1].mxu1 }
 0x127   : > { %676 = vst [vmem:[%s1162_s28 + $0x8] sm:$0xff] %v518_v34  ;;  %708 = vst [vmem:[%s1162_s28 + $0x108] sm:$0xff] %v598_v35  ;;  %v520_v36 = vpop.f32.mrb[2].mxu0  ;;  %v600_v37 = vpop.f32.mrb[2].mxu1 }
 0x128   : > { %677 = vst [vmem:[%s1162_s28 + $0x10] sm:$0xff] %v520_v36  ;;  %709 = vst [vmem:[%s1162_s28 + $0x110] sm:$0xff] %v600_v37  ;;  %v522_v38 = vpop.f32.mrb[3].mxu0  ;;  %v602_v39 = vpop.f32.mrb[3].mxu1 }
 0x129   : > { %678 = vst [vmem:[%s1162_s28 + $0x18] sm:$0xff] %v522_v38  ;;  %710 = vst [vmem:[%s1162_s28 + $0x118] sm:$0xff] %v602_v39 }
 0x12d   : > { %v526_v40 = vpop.f32.mrb[4].mxu0  ;;  %v606_v41 = vpop.f32.mrb[4].mxu1 }
 0x12e   : > { %679 = vst [vmem:[%s1162_s28 + $0x20] sm:$0xff] %v526_v40  ;;  %711 = vst [vmem:[%s1162_s28 + $0x120] sm:$0xff] %v606_v41  ;;  %v528_v42 = vpop.f32.mrb[5].mxu0  ;;  %v608_v43 = vpop.f32.mrb[5].mxu1 }
 0x12f   : > { %680 = vst [vmem:[%s1162_s28 + $0x28] sm:$0xff] %v528_v42  ;;  %712 = vst [vmem:[%s1162_s28 + $0x128] sm:$0xff] %v608_v43  ;;  %v530_v44 = vpop.f32.mrb[6].mxu0  ;;  %v610_v45 = vpop.f32.mrb[6].mxu1 }
 0x130   : > { %681 = vst [vmem:[%s1162_s28 + $0x30] sm:$0xff] %v530_v44  ;;  %713 = vst [vmem:[%s1162_s28 + $0x130] sm:$0xff] %v610_v45  ;;  %v532_v46 = vpop.f32.mrb[7].mxu0  ;;  %v612_v47 = vpop.f32.mrb[7].mxu1 }
 0x131   : > { %682 = vst [vmem:[%s1162_s28 + $0x38] sm:$0xff] %v532_v46  ;;  %714 = vst [vmem:[%s1162_s28 + $0x138] sm:$0xff] %v612_v47 }
 0x135   : > { %v536_v48 = vpop.f32.mrb[8].mxu0  ;;  %v616_v49 = vpop.f32.mrb[8].mxu1 }
 0x136   : > { %683 = vst [vmem:[%s1162_s28 + $0x40] sm:$0xff] %v536_v48  ;;  %715 = vst [vmem:[%s1162_s28 + $0x140] sm:$0xff] %v616_v49  ;;  %v538_v50 = vpop.f32.mrb[9].mxu0  ;;  %v618_v51 = vpop.f32.mrb[9].mxu1 }
 0x137   : > { %684 = vst [vmem:[%s1162_s28 + $0x48] sm:$0xff] %v538_v50  ;;  %716 = vst [vmem:[%s1162_s28 + $0x148] sm:$0xff] %v618_v51  ;;  %v540_v52 = vpop.f32.mrb[10].mxu0  ;;  %v620_v53 = vpop.f32.mrb[10].mxu1 }
 0x138   : > { %685 = vst [vmem:[%s1162_s28 + $0x50] sm:$0xff] %v540_v52  ;;  %717 = vst [vmem:[%s1162_s28 + $0x150] sm:$0xff] %v620_v53  ;;  %v542_v54 = vpop.f32.mrb[11].mxu0  ;;  %v622_v55 = vpop.f32.mrb[11].mxu1 }
 0x139   : > { %686 = vst [vmem:[%s1162_s28 + $0x58] sm:$0xff] %v542_v54  ;;  %718 = vst [vmem:[%s1162_s28 + $0x158] sm:$0xff] %v622_v55 }
 0x13d   : > { %v546_v56 = vpop.f32.mrb[12].mxu0  ;;  %v626_v57 = vpop.f32.mrb[12].mxu1 }
 0x13e   : > { %687 = vst [vmem:[%s1162_s28 + $0x60] sm:$0xff] %v546_v56  ;;  %719 = vst [vmem:[%s1162_s28 + $0x160] sm:$0xff] %v626_v57  ;;  %v548_v58 = vpop.f32.mrb[13].mxu0  ;;  %v628_v59 = vpop.f32.mrb[13].mxu1 }
 0x13f   : > { %688 = vst [vmem:[%s1162_s28 + $0x68] sm:$0xff] %v548_v58  ;;  %720 = vst [vmem:[%s1162_s28 + $0x168] sm:$0xff] %v628_v59  ;;  %v550_v60 = vpop.f32.mrb[14].mxu0  ;;  %v630_v61 = vpop.f32.mrb[14].mxu1 }
 0x140   : > { %689 = vst [vmem:[%s1162_s28 + $0x70] sm:$0xff] %v550_v60  ;;  %721 = vst [vmem:[%s1162_s28 + $0x170] sm:$0xff] %v630_v61  ;;  %v552_v62 = vpop.f32.mrb[15].mxu0  ;;  %v632_v63 = vpop.f32.mrb[15].mxu1 }
 0x141   : > { %690 = vst [vmem:[%s1162_s28 + $0x78] sm:$0xff] %v552_v62  ;;  %722 = vst [vmem:[%s1162_s28 + $0x178] sm:$0xff] %v632_v63 }
 0x145   : > { %v556_v0 = vpop.f32.mrb[16].mxu0  ;;  %v636_v1 = vpop.f32.mrb[16].mxu1 }
 0x146   : > { %691 = vst [vmem:[%s1162_s28 + $0x80] sm:$0xff] %v556_v0  ;;  %723 = vst [vmem:[%s1162_s28 + $0x180] sm:$0xff] %v636_v1  ;;  %v558_v2 = vpop.f32.mrb[17].mxu0  ;;  %v638_v3 = vpop.f32.mrb[17].mxu1 }
 0x147   : > { %692 = vst [vmem:[%s1162_s28 + $0x88] sm:$0xff] %v558_v2  ;;  %724 = vst [vmem:[%s1162_s28 + $0x188] sm:$0xff] %v638_v3  ;;  %v560_v4 = vpop.f32.mrb[18].mxu0  ;;  %v640_v5 = vpop.f32.mrb[18].mxu1 }
 0x148   : > { %693 = vst [vmem:[%s1162_s28 + $0x90] sm:$0xff] %v560_v4  ;;  %725 = vst [vmem:[%s1162_s28 + $0x190] sm:$0xff] %v640_v5  ;;  %v562_v6 = vpop.f32.mrb[19].mxu0  ;;  %v642_v7 = vpop.f32.mrb[19].mxu1 }
 0x149   : > { %694 = vst [vmem:[%s1162_s28 + $0x98] sm:$0xff] %v562_v6  ;;  %726 = vst [vmem:[%s1162_s28 + $0x198] sm:$0xff] %v642_v7 }
 0x14d   : > { %v566_v8 = vpop.f32.mrb[20].mxu0  ;;  %v646_v9 = vpop.f32.mrb[20].mxu1 }
 0x14e   : > { %695 = vst [vmem:[%s1162_s28 + $0xa0] sm:$0xff] %v566_v8  ;;  %727 = vst [vmem:[%s1162_s28 + $0x1a0] sm:$0xff] %v646_v9  ;;  %v568_v10 = vpop.f32.mrb[21].mxu0  ;;  %v648_v11 = vpop.f32.mrb[21].mxu1 }
 0x14f   : > { %696 = vst [vmem:[%s1162_s28 + $0xa8] sm:$0xff] %v568_v10  ;;  %728 = vst [vmem:[%s1162_s28 + $0x1a8] sm:$0xff] %v648_v11  ;;  %v570_v12 = vpop.f32.mrb[22].mxu0  ;;  %v650_v13 = vpop.f32.mrb[22].mxu1 }
 0x150   : > { %697 = vst [vmem:[%s1162_s28 + $0xb0] sm:$0xff] %v570_v12  ;;  %729 = vst [vmem:[%s1162_s28 + $0x1b0] sm:$0xff] %v650_v13  ;;  %v572_v14 = vpop.f32.mrb[23].mxu0  ;;  %v652_v15 = vpop.f32.mrb[23].mxu1 }
 0x151   : > { %698 = vst [vmem:[%s1162_s28 + $0xb8] sm:$0xff] %v572_v14  ;;  %730 = vst [vmem:[%s1162_s28 + $0x1b8] sm:$0xff] %v652_v15 }
 0x155   : > { %v576_v16 = vpop.f32.mrb[24].mxu0  ;;  %v656_v17 = vpop.f32.mrb[24].mxu1 }
 0x156   : > { %699 = vst [vmem:[%s1162_s28 + $0xc0] sm:$0xff] %v576_v16  ;;  %731 = vst [vmem:[%s1162_s28 + $0x1c0] sm:$0xff] %v656_v17  ;;  %v578_v18 = vpop.f32.mrb[25].mxu0  ;;  %v658_v19 = vpop.f32.mrb[25].mxu1 }
 0x157   : > { %700 = vst [vmem:[%s1162_s28 + $0xc8] sm:$0xff] %v578_v18  ;;  %732 = vst [vmem:[%s1162_s28 + $0x1c8] sm:$0xff] %v658_v19  ;;  %v580_v20 = vpop.f32.mrb[26].mxu0  ;;  %v660_v21 = vpop.f32.mrb[26].mxu1 }
 0x158   : > { %701 = vst [vmem:[%s1162_s28 + $0xd0] sm:$0xff] %v580_v20  ;;  %733 = vst [vmem:[%s1162_s28 + $0x1d0] sm:$0xff] %v660_v21  ;;  %v582_v22 = vpop.f32.mrb[27].mxu0  ;;  %v662_v23 = vpop.f32.mrb[27].mxu1 }
 0x159   : > { %702 = vst [vmem:[%s1162_s28 + $0xd8] sm:$0xff] %v582_v22  ;;  %734 = vst [vmem:[%s1162_s28 + $0x1d8] sm:$0xff] %v662_v23 }
 0x15d   : > { %v586_v24 = vpop.f32.mrb[28].mxu0  ;;  %v666_v25 = vpop.f32.mrb[28].mxu1 }
 0x15e   : > { %703 = vst [vmem:[%s1162_s28 + $0xe0] sm:$0xff] %v586_v24  ;;  %735 = vst [vmem:[%s1162_s28 + $0x1e0] sm:$0xff] %v666_v25  ;;  %v588_v26 = vpop.f32.mrb[29].mxu0  ;;  %v668_v27 = vpop.f32.mrb[29].mxu1 }
 0x15f   : > { %704 = vst [vmem:[%s1162_s28 + $0xe8] sm:$0xff] %v588_v26  ;;  %736 = vst [vmem:[%s1162_s28 + $0x1e8] sm:$0xff] %v668_v27  ;;  %v590_v28 = vpop.f32.mrb[30].mxu0  ;;  %v670_v29 = vpop.f32.mrb[30].mxu1 }
 0x160   : > { %705 = vst [vmem:[%s1162_s28 + $0xf0] sm:$0xff] %v590_v28  ;;  %737 = vst [vmem:[%s1162_s28 + $0x1f0] sm:$0xff] %v670_v29  ;;  %v592_v30 = vpop.f32.mrb[31].mxu0  ;;  %v672_v31 = vpop.f32.mrb[31].mxu1 }
 0x161   : > { %706 = vst [vmem:[%s1162_s28 + $0xf8] sm:$0xff] %v592_v30  ;;  %738 = vst [vmem:[%s1162_s28 + $0x1f8] sm:$0xff] %v672_v31 }
 0x162 PF: > { %s12_s11 = sadd.s32 1, %s1051_s11   ;;  %s1240_s9 = smov %s1047_s10 }
 0x163   : > { %p9_p5 = scmp.ge.s32.totalorder %s12_s11, 6   ;;  %s1241_s10 = smov %s1243_s12 }
 0x165   :  { %11 = sbr.rel (!%p9_p5) target bundleno = 2 (0x2), region = 61 }

</bundles_post_ra>
